<compile_context>
chip_gen: v7x
topology: tpu7x:2x2x1
jax: 0.10.0
libtpu: 0.0.40
codegen_flags: <defaults>
</compile_context>

<pallas_src>
import functools

import jax
import jax.numpy as jnp
from jax.experimental import pallas as pl
from jax.experimental.pallas import tpu as pltpu

LANE = 128


def _round_up(x, m):
    return (x + m - 1) // m * m


def _fused_mlp_kernel(x_ref, w0_ref, b0_ref, w1_ref, b1_ref, w2_ref, b2_ref, o_ref):
    """backbone(Linear+ReLU x2) + fc, fully fused; intermediates never leave VMEM."""
    # Layer 1: [B,K0p]@[K0p,H1] on MXU (bf16 operands, f32 acc), f32 epilogue on VPU.
    h = jnp.dot(x_ref[...], w0_ref[...], preferred_element_type=jnp.float32)
    h = jnp.maximum(h + b0_ref[...], 0.0)
    # Layer 2: [B,H1]@[H1,H2]
    h = jnp.dot(h.astype(jnp.bfloat16), w1_ref[...], preferred_element_type=jnp.float32)
    h = jnp.maximum(h + b1_ref[...], 0.0)
    # fc: [B,H2]@[H2,Doutp] (Doutp = 128-padded) -> lane-dense unmasked store.
    out = jnp.dot(h.astype(jnp.bfloat16), w2_ref[...], preferred_element_type=jnp.float32)
    out = out + b2_ref[...]
    o_ref[...] = out.astype(o_ref.dtype)


def init_mlp_params(key, in_dim, out_dim, arch=(256, 256), dtype=jnp.float32):
    """Deterministic synthetic init (Kaiming-uniform-ish like nn.Linear default)."""
    params = []
    d_in = in_dim
    dims = list(arch) + [out_dim]
    for d_out in dims:
        key, kw, kb = jax.random.split(key, 3)
        bound = 1.0 / jnp.sqrt(jnp.asarray(d_in, dtype))
        w = jax.random.uniform(kw, (d_in, d_out), dtype, -bound, bound)
        b = jax.random.uniform(kb, (1, d_out), dtype, -bound, bound)
        params.append((w, b))
        d_in = d_out
    return params


def prepare_params(params, in_dim):
    """One-time prep: pad to MXU/lane-friendly shapes, cast weights to bf16.

    - w0 rows (contraction dim) zero-padded in_dim -> 128-multiple.
    - fc weight cols / bias zero-padded out_dim -> 128-multiple (lane-dense store).
    - weights bf16 (MXU-native), biases stay f32 (f32 epilogue).
    """
    (w0, b0), (w1, b1), (w2, b2) = params
    k0p = _round_up(in_dim, LANE)
    doutp = _round_up(w2.shape[1], LANE)

    w0p = jnp.zeros((k0p, w0.shape[1]), jnp.float32).at[:in_dim, :].set(w0)
    w2p = jnp.zeros((w2.shape[0], doutp), jnp.float32).at[:, : w2.shape[1]].set(w2)
    b2p = jnp.zeros((1, doutp), jnp.float32).at[:, : b2.shape[1]].set(b2)

    return (
        w0p.astype(jnp.bfloat16),
        b0.astype(jnp.float32),
        w1.astype(jnp.bfloat16),
        b1.astype(jnp.float32),
        w2p.astype(jnp.bfloat16),
        b2p,
    )


@functools.partial(jax.jit, static_argnames=("out_dim",))
def mlp_forward(state, prepared, out_dim):
    """Matches MLP.forward(state) for this arg config:
       backbone = [Linear + Identity(drop) + Identity(bn) + ReLU] x 2
       feat     = Identity
       fc       = Linear(bias=True)
    """
    w0, b0, w1, b1, w2, b2 = prepared
    B, in_dim = state.shape
    k0p = w0.shape[0]
    doutp = w2.shape[1]
    h1 = w0.shape[1]
    h2 = w1.shape[1]

    # Zero-pad input features to lane width and cast to bf16 for the MXU.
    xp = jnp.zeros((B, k0p), jnp.float32).at[:, :in_dim].set(state).astype(jnp.bfloat16)

    flops = 2 * B * (k0p * h1 + h1 * h2 + h2 * doutp)
    bytes_accessed = (
        xp.size * 2 + w0.size * 2 + w1.size * 2 + w2.size * 2
        + b0.size * 4 + b1.size * 4 + b2.size * 4 + B * doutp * 4
    )

    out_padded = pl.pallas_call(
        _fused_mlp_kernel,
        out_shape=jax.ShapeDtypeStruct((B, doutp), jnp.float32),
        in_specs=[pl.BlockSpec(memory_space=pltpu.MemorySpace.VMEM)] * 7,
        out_specs=pl.BlockSpec(memory_space=pltpu.MemorySpace.VMEM),
        cost_estimate=pl.CostEstimate(
            flops=flops, transcendentals=0, bytes_accessed=bytes_accessed
        ),
    )(xp, w0, b0, w1, b1, w2, b2)

    return out_padded[:, :out_dim]


def mlp_reference(state, params):
    """Plain-JAX reference with identical bf16-operand / f32-accumulate numerics."""
    x = state
    for (w, b) in params[:-1]:
        x = jnp.maximum(
            jnp.dot(x.astype(jnp.bfloat16), w.astype(jnp.bfloat16),
                    preferred_element_type=jnp.float32) + b,
            0.0,
        )
    w, b = params[-1]
    return jnp.dot(x.astype(jnp.bfloat16), w.astype(jnp.bfloat16),
                   preferred_element_type=jnp.float32) + b


if __name__ == "__main__":
    # TODO(synk): Dropout / BatchNorm1d / feat branches (args.drop>=0, args.bn in
    # {'t','p'}, args.feat in {'b','f'}) are Identity in this config; not implemented.
    batch, in_dim, out_dim = 8, 32, 8
    key = jax.random.PRNGKey(0)
    key, kx = jax.random.split(key)
    state = jax.random.normal(kx, (batch, in_dim), jnp.float32)

    params = init_mlp_params(key, in_dim, out_dim, arch=(256, 256))
    prepared = prepare_params(params, in_dim)

    out = mlp_forward(state, prepared, out_dim)
    out = jax.block_until_ready(out)

    ref = mlp_reference(state, params)
    assert out.shape == (batch, out_dim)
    assert jnp.allclose(out, ref, atol=1e-2, rtol=1e-2), (
        float(jnp.max(jnp.abs(out - ref)))
    )

    print("KERNEL_OK")
</pallas_src>

<mosaic_0001>
module attributes {stable_mosaic.version = 11 : i64} {
  func.func @_fused_mlp_kernel(%arg0: memref<8x128xbf16, #tpu.memory_space<vmem>>, %arg1: memref<128x256xbf16, #tpu.memory_space<vmem>>, %arg2: memref<1x256xf32, #tpu.memory_space<vmem>>, %arg3: memref<256x256xbf16, #tpu.memory_space<vmem>>, %arg4: memref<1x256xf32, #tpu.memory_space<vmem>>, %arg5: memref<256x128xbf16, #tpu.memory_space<vmem>>, %arg6: memref<1x128xf32, #tpu.memory_space<vmem>>, %arg7: memref<8x128xf32, #tpu.memory_space<vmem>>) attributes {dimension_semantics = [], scalar_prefetch = 0 : i64, scratch_operands = 0 : i64, tpu.core_type = #tpu.core_type<tc>} {
    %c0 = arith.constant 0 : index
    %c0_0 = arith.constant 0 : index
    %0 = vector.load %arg0[%c0, %c0_0] : memref<8x128xbf16, #tpu.memory_space<vmem>>, vector<8x128xbf16>
    %c0_1 = arith.constant 0 : index
    %c0_2 = arith.constant 0 : index
    %1 = vector.load %arg1[%c0_1, %c0_2] : memref<128x256xbf16, #tpu.memory_space<vmem>>, vector<128x256xbf16>
    %cst = arith.constant dense<0.000000e+00> : vector<8x256xf32>
    %2 = tpu.matmul %0, %1, %cst {dimension_numbers = #tpu.dot_dimension_numbers<[1], [0], [0], [1], [0, 0, 1, 1], [], []>} : vector<8x128xbf16>, vector<128x256xbf16>, vector<8x256xf32> -> vector<8x256xf32>
    %c0_3 = arith.constant 0 : index
    %c0_4 = arith.constant 0 : index
    %3 = vector.load %arg2[%c0_3, %c0_4] : memref<1x256xf32, #tpu.memory_space<vmem>>, vector<1x256xf32>
    %4 = vector.broadcast %3 : vector<1x256xf32> to vector<8x256xf32>
    %5 = arith.addf %2, %4 : vector<8x256xf32>
    %cst_5 = arith.constant 0.000000e+00 : f32
    %6 = vector.broadcast %cst_5 : f32 to vector<8x256xf32>
    %7 = arith.maximumf %5, %6 : vector<8x256xf32>
    %8 = arith.truncf %7 : vector<8x256xf32> to vector<8x256xbf16>
    %c0_6 = arith.constant 0 : index
    %c0_7 = arith.constant 0 : index
    %9 = vector.load %arg3[%c0_6, %c0_7] : memref<256x256xbf16, #tpu.memory_space<vmem>>, vector<256x256xbf16>
    %cst_8 = arith.constant dense<0.000000e+00> : vector<8x256xf32>
    %10 = tpu.matmul %8, %9, %cst_8 {dimension_numbers = #tpu.dot_dimension_numbers<[1], [0], [0], [1], [0, 0, 1, 1], [], []>} : vector<8x256xbf16>, vector<256x256xbf16>, vector<8x256xf32> -> vector<8x256xf32>
    %c0_9 = arith.constant 0 : index
    %c0_10 = arith.constant 0 : index
    %11 = vector.load %arg4[%c0_9, %c0_10] : memref<1x256xf32, #tpu.memory_space<vmem>>, vector<1x256xf32>
    %12 = vector.broadcast %11 : vector<1x256xf32> to vector<8x256xf32>
    %13 = arith.addf %10, %12 : vector<8x256xf32>
    %cst_11 = arith.constant 0.000000e+00 : f32
    %14 = vector.broadcast %cst_11 : f32 to vector<8x256xf32>
    %15 = arith.maximumf %13, %14 : vector<8x256xf32>
    %16 = arith.truncf %15 : vector<8x256xf32> to vector<8x256xbf16>
    %c0_12 = arith.constant 0 : index
    %c0_13 = arith.constant 0 : index
    %17 = vector.load %arg5[%c0_12, %c0_13] : memref<256x128xbf16, #tpu.memory_space<vmem>>, vector<256x128xbf16>
    %cst_14 = arith.constant dense<0.000000e+00> : vector<8x128xf32>
    %18 = tpu.matmul %16, %17, %cst_14 {dimension_numbers = #tpu.dot_dimension_numbers<[1], [0], [0], [1], [0, 0, 1, 1], [], []>} : vector<8x256xbf16>, vector<256x128xbf16>, vector<8x128xf32> -> vector<8x128xf32>
    %c0_15 = arith.constant 0 : index
    %c0_16 = arith.constant 0 : index
    %19 = vector.load %arg6[%c0_15, %c0_16] : memref<1x128xf32, #tpu.memory_space<vmem>>, vector<1x128xf32>
    %20 = vector.broadcast %19 : vector<1x128xf32> to vector<8x128xf32>
    %21 = arith.addf %18, %20 : vector<8x128xf32>
    %c0_17 = arith.constant 0 : index
    %c0_18 = arith.constant 0 : index
    %22 = vector.load %arg7[%c0_17, %c0_18] : memref<8x128xf32, #tpu.memory_space<vmem>>, vector<8x128xf32>
    tpu.vector_store %arg7[%c0_17, %c0_18], %21 {strides = array<i32>} : memref<8x128xf32, #tpu.memory_space<vmem>>, vector<8x128xf32>,
    return
  }
}

</mosaic_0001>

<bundles_post_ra>
// kernel: mlp_forward.1
= control target key start
LH: loop header
LB: loop body
LE: loop exit
PB: predicated region body
PF: predicated region fallthrough
CT: control target
= control target key end

     0   :  { %12 = vsyncpa [#allocation3], 0  ;;  %s1058_s0 = inlined_call_operand.vmem [shape: bf16[8,128], index: 0, kind: input, shape index: {}]   ;;  %s1059_s1 = inlined_call_operand.hbm [shape: bf16[128,256], index: 1, kind: input, shape index: {}]   ;;  %s1060_s2 = inlined_call_operand.vmem [shape: f32[1,256], index: 2, kind: input, shape index: {}]   ;;  %s1061_s3 = inlined_call_operand.hbm [shape: bf16[256,256], index: 3, kind: input, shape index: {}]   ;;  %s1062_s4 = inlined_call_operand.vmem [shape: f32[1,256], index: 4, kind: input, shape index: {}]   ;;  %s1063_s5 = inlined_call_operand.hbm [shape: bf16[256,128], index: 5, kind: input, shape index: {}]   ;;  %s1064_s6 = inlined_call_operand.vmem [shape: f32[1,128], index: 6, kind: input, shape index: {}]   ;;  %s1065_s7 = inlined_call_operand.hbm [shape: f32[8,128], index: 7, kind: output, shape index: {}]  }
   0x1   :  { %13 = vsyncpa [#allocation6], 0 }
   0x2   :  { %14 = vsyncpa [#allocation4], 0  ;;  %s942_s24 = smov [#allocation5]   ;;  %s943_s26 = smov [#allocation2]  }
   0x3   :  { %s36_s25 = sshll.u32 %s942_s24, 4  ;;  %s22_s27 = sshll.u32 %s943_s26, 4  ;;  %s37_s25 = int_to_ptr.vmem [resolvable:$true] %s36_s25  ;;  %s991_s27 = int_to_ptr.vmem [resolvable:$true] %s22_s27 }
   0x4   :  { %s848_s30 = scalar_lea.hbm %s1061_s3, 4096 }
   0x5   :  { %p849_p0 = scmp.ne.s32.totalorder %s1061_s3, %s848_s30  ;;  %p852_p1 = scmp.lt.u32.totalorder %s848_s30, %s1061_s3 }
   0x7   :  { %p854_p2 = pnand %p852_p1, %p849_p0 }
   0x9   :  { %857 = shalt.err (!%p854_p2)
}
   0xa   :  { %s858_s12 = scalar_lea.vmem %s37_s25, 4096  ;;  %p863_p4 = scmp.lt.s32.totalorder %s37_s25, %s37_s25 }
   0xb   :  { %p859_p3 = scmp.ne.s32.totalorder %s37_s25, %s858_s12  ;;  %p864_p5 = scmp.lt.s32.totalorder %s858_s12, %s858_s12 }
   0xd   :  { %p865_p6 = por %p864_p5, %p863_p4 }
   0xf   :  { %p866_p7 = pnand %p865_p6, %p859_p3 }
  0x11   :  { %869 = shalt.err (!%p866_p7)
}
  0x12   :  { %s944_s13 = smov 128   ;;  %s945_s14 = smov 8  }
  0x13   :  { %42 = dma.hbm_to_vmem [thread:$0]  %s1061_s3, 4096, %s37_s25, [#allocation6], %s944_s13, %s944_s13, %s945_s14  }
  0x14   :  { %s870_s19 = scalar_lea.hbm %s1059_s1, 2048 }
  0x15   :  { %p871_p8 = scmp.ne.s32.totalorder %s1059_s1, %s870_s19  ;;  %p874_p9 = scmp.lt.u32.totalorder %s870_s19, %s1059_s1 }
  0x17   :  { %p876_p10 = pnand %p874_p9, %p871_p8 }
  0x19   :  { %879 = shalt.err (!%p876_p10)
}
  0x1a   :  { %s880_s24 = scalar_lea.vmem %s991_s27, 2048  ;;  %p885_p12 = scmp.lt.s32.totalorder %s991_s27, %s991_s27 }
  0x1b   :  { %p881_p11 = scmp.ne.s32.totalorder %s991_s27, %s880_s24  ;;  %p886_p13 = scmp.lt.s32.totalorder %s880_s24, %s880_s24 }
  0x1d   :  { %p887_p0 = por %p886_p13, %p885_p12 }
  0x1f   :  { %p888_p1 = pnand %p887_p0, %p881_p11 }
  0x21   :  { %891 = shalt.err (!%p888_p1)
}
  0x22   :  { %28 = dma.hbm_to_vmem [thread:$0]  %s1059_s1, 2048, %s991_s27, [#allocation3], %s944_s13, %s944_s13, %s945_s14  }
  0x23   :  { %s946_s26 = smov [#allocation7]   ;;  %s892_s8 = scalar_lea.hbm %s1063_s5, 2048 }
  0x24   :  { %s50_s28 = sshll.u32 %s946_s26, 4  ;;  %p893_p2 = scmp.ne.s32.totalorder %s1063_s5, %s892_s8  ;;  %s51_s28 = int_to_ptr.vmem [resolvable:$true] %s50_s28 }
  0x25   :  { %p896_p3 = scmp.lt.u32.totalorder %s892_s8, %s1063_s5 }
  0x27   :  { %p898_p4 = pnand %p896_p3, %p893_p2 }
  0x29   :  { %901 = shalt.err (!%p898_p4)
}
  0x2a   :  { %s902_s15 = scalar_lea.vmem %s51_s28, 2048  ;;  %p907_p6 = scmp.lt.s32.totalorder %s51_s28, %s51_s28 }
  0x2b   :  { %p903_p5 = scmp.ne.s32.totalorder %s51_s28, %s902_s15  ;;  %p908_p7 = scmp.lt.s32.totalorder %s902_s15, %s902_s15 }
  0x2d   :  { %p909_p8 = por %p908_p7, %p907_p6 }
  0x2f   :  { %p910_p9 = pnand %p909_p8, %p903_p5 }
  0x31   :  { %913 = shalt.err (!%p910_p9)
}
  0x32   :  { %s947_s1 = smov 64   ;;  %s948_s27 = smov 4  }
  0x33   :  { %56 = dma.hbm_to_vmem [thread:$0]  %s1063_s5, 2048, %s51_s28, [#allocation6], %s947_s1, %s947_s1, %s948_s27  }
  0x34   :  { %936 = dma.done.wait [#allocation3], 2048  }
  0x35   :  { %937 = vsyncadd [#allocation3], 4294965248 }
  0x36   :  { %938 = dma.done.wait [#allocation6], 6144  }
  0x37   :  { %939 = vsyncadd [#allocation6], 4294961152  ;;  %v949_v0 = vmov 0   ;;  %v760_v1 = vld [vmem:[#allocation2 + $0x4] ss:$8 sps:$4 sm:$0xff]   ;;  %v836_v54 = vld [vmem:[#allocation7 + $0x50] sm:$0xff]   ;;  %v88_v62 = vlaneseq }
  0x38   :  { %210 = vmatprep.mubr.bf16.mxu0 %v949_v0  ;;  %v762_v2 = vld [vmem:[#allocation2] ss:$8 sps:$4 sm:$0xff]   ;;  %178 = vmatprep.subr.bf16.mxu0 %v760_v1  ;;  %v763_v3 = vld [vmem:[#allocation2 + $0x14] ss:$8 sps:$4 sm:$0xff]   ;;  %v765_v4 = vld [vmem:[#allocation2 + $0x10] ss:$8 sps:$4 sm:$0xff]  }
  0x39   :  { %179 = vmatpush1.bf16.msra.mxu0 %v762_v2  ;;  %v766_v5 = vld [vmem:[#allocation2 + $0x24] ss:$8 sps:$4 sm:$0xff]   ;;  %v768_v6 = vld [vmem:[#allocation2 + $0x20] ss:$8 sps:$4 sm:$0xff]   ;;  %v769_v7 = vld [vmem:[#allocation2 + $0x34] ss:$8 sps:$4 sm:$0xff]  }
  0x3a   :  { %180 = vmatprep.subr.bf16.mxu0 %v763_v3  ;;  %v771_v8 = vld [vmem:[#allocation2 + $0x30] ss:$8 sps:$4 sm:$0xff]   ;;  %v772_v9 = vld [vmem:[#allocation2 + $0x44] ss:$8 sps:$4 sm:$0xff]   ;;  %v786_v11 = vld [vmem:[#allocation5] ss:$8 sps:$4 sm:$0xff]  }
  0x3b   :  { %v784_v10 = vld [vmem:[#allocation5 + $0x4] ss:$8 sps:$4 sm:$0xff]   ;;  %v787_v12 = vld [vmem:[#allocation5 + $0x14] ss:$8 sps:$4 sm:$0xff]   ;;  %v774_v13 = vld [vmem:[#allocation2 + $0x40] ss:$8 sps:$4 sm:$0xff]  }
  0x3c   :  { %427 = vmatprep.subr.bf16.mxu1 %v784_v10  ;;  %v789_v14 = vld [vmem:[#allocation5 + $0x10] ss:$8 sps:$4 sm:$0xff]   ;;  %v790_v15 = vld [vmem:[#allocation5 + $0x24] ss:$8 sps:$4 sm:$0xff]   ;;  %v775_v16 = vld [vmem:[#allocation2 + $0x54] ss:$8 sps:$4 sm:$0xff]  }
  0x3d   :  { %181 = vmatpush1.bf16.msra.mxu0 %v765_v4  ;;  %428 = vmatpush1.bf16.msra.mxu1 %v786_v11  ;;  %v777_v17 = vld [vmem:[#allocation2 + $0x50] ss:$8 sps:$4 sm:$0xff]   ;;  %v792_v18 = vld [vmem:[#allocation5 + $0x20] ss:$8 sps:$4 sm:$0xff]   ;;  %v793_v19 = vld [vmem:[#allocation5 + $0x34] ss:$8 sps:$4 sm:$0xff]  }
  0x3e   :  { %182 = vmatprep.subr.bf16.mxu0 %v766_v5  ;;  %429 = vmatprep.subr.bf16.mxu1 %v787_v12  ;;  %v778_v20 = vld [vmem:[#allocation2 + $0x64] ss:$8 sps:$4 sm:$0xff]   ;;  %v780_v21 = vld [vmem:[#allocation2 + $0x60] ss:$8 sps:$4 sm:$0xff]   ;;  %v795_v22 = vld [vmem:[#allocation5 + $0x30] ss:$8 sps:$4 sm:$0xff]  }
  0x3f   :  { %v796_v23 = vld [vmem:[#allocation5 + $0x44] ss:$8 sps:$4 sm:$0xff]   ;;  %v781_v24 = vld [vmem:[#allocation2 + $0x74] ss:$8 sps:$4 sm:$0xff]   ;;  %v783_v25 = vld [vmem:[#allocation2 + $0x70] ss:$8 sps:$4 sm:$0xff]  }
  0x40   :  { %v798_v26 = vld [vmem:[#allocation5 + $0x40] ss:$8 sps:$4 sm:$0xff]   ;;  %v799_v27 = vld [vmem:[#allocation5 + $0x54] ss:$8 sps:$4 sm:$0xff]   ;;  %v801_v29 = vld [vmem:[#allocation5 + $0x50] ss:$8 sps:$4 sm:$0xff]  }
  0x41   :  { %183 = vmatpush1.bf16.msra.mxu0 %v768_v6  ;;  %430 = vmatpush1.bf16.msra.mxu1 %v789_v14  ;;  %v69_v28 = vld [vmem:[%s1058_s0] sm:$0xf]  ;;  %v802_v30 = vld [vmem:[#allocation5 + $0x64] ss:$8 sps:$4 sm:$0xff]   ;;  %v805_v32 = vld [vmem:[#allocation5 + $0x74] ss:$8 sps:$4 sm:$0xff]  }
  0x42   :  { %184 = vmatprep.subr.bf16.mxu0 %v769_v7  ;;  %431 = vmatprep.subr.bf16.mxu1 %v790_v15  ;;  %v804_v31 = vld [vmem:[#allocation5 + $0x60] ss:$8 sps:$4 sm:$0xff]   ;;  %v807_v33 = vld [vmem:[#allocation5 + $0x70] ss:$8 sps:$4 sm:$0xff]   ;;  %v808_v34 = vld [vmem:[#allocation5 + $0x84] ss:$8 sps:$4 sm:$0xff]  }
  0x43   :  { %v810_v35 = vld [vmem:[#allocation5 + $0x80] ss:$8 sps:$4 sm:$0xff]   ;;  %v811_v36 = vld [vmem:[#allocation5 + $0x94] ss:$8 sps:$4 sm:$0xff]   ;;  %v813_v37 = vld [vmem:[#allocation5 + $0x90] ss:$8 sps:$4 sm:$0xff]  }
  0x44   :  { %v814_v38 = vld [vmem:[#allocation5 + $0xa4] ss:$8 sps:$4 sm:$0xff]   ;;  %v816_v39 = vld [vmem:[#allocation5 + $0xa0] ss:$8 sps:$4 sm:$0xff]   ;;  %v817_v40 = vld [vmem:[#allocation5 + $0xb4] ss:$8 sps:$4 sm:$0xff]  }
  0x45   :  { %185 = vmatpush1.bf16.msra.mxu0 %v771_v8  ;;  %432 = vmatpush1.bf16.msra.mxu1 %v792_v18  ;;  %v819_v41 = vld [vmem:[#allocation5 + $0xb0] ss:$8 sps:$4 sm:$0xff]   ;;  %v820_v42 = vld [vmem:[#allocation5 + $0xc4] ss:$8 sps:$4 sm:$0xff]   ;;  %v822_v43 = vld [vmem:[#allocation5 + $0xc0] ss:$8 sps:$4 sm:$0xff]  }
  0x46   :  { %186 = vmatprep.subr.bf16.mxu0 %v772_v9  ;;  %433 = vmatprep.subr.bf16.mxu1 %v793_v19  ;;  %v823_v44 = vld [vmem:[#allocation5 + $0xd4] ss:$8 sps:$4 sm:$0xff]   ;;  %v825_v45 = vld [vmem:[#allocation5 + $0xd0] ss:$8 sps:$4 sm:$0xff]   ;;  %v826_v46 = vld [vmem:[#allocation5 + $0xe4] ss:$8 sps:$4 sm:$0xff]  }
  0x47   :  { %v828_v47 = vld [vmem:[#allocation5 + $0xe0] ss:$8 sps:$4 sm:$0xff]   ;;  %v829_v48 = vld [vmem:[#allocation5 + $0xf4] ss:$8 sps:$4 sm:$0xff]   ;;  %v831_v49 = vld [vmem:[#allocation5 + $0xf0] ss:$8 sps:$4 sm:$0xff]  }
  0x48   :  { %v832_v50 = vld [vmem:[#allocation7 + $0x40] sm:$0xff]   ;;  %v834_v52 = vld [vmem:[#allocation7 + $0x48] sm:$0xff]   ;;  %v837_v55 = vld [vmem:[#allocation7 + $0x10] sm:$0xff]   ;;  %v89_v63 = vshrl.u32 %v88_v62, 7 }
  0x49   :  { %187 = vmatpush1.bf16.msra.mxu0 %v774_v13  ;;  %434 = vmatpush1.bf16.msra.mxu1 %v795_v22  ;;  %v833_v51 = vld [vmem:[#allocation7] sm:$0xff]   ;;  %v835_v53 = vld [vmem:[#allocation7 + $0x8] sm:$0xff]   ;;  %v838_v56 = vld [vmem:[#allocation7 + $0x58] sm:$0xff]  }
  0x4a   :  { %188 = vmatprep.subr.bf16.mxu0 %v775_v16  ;;  %435 = vmatprep.subr.bf16.mxu1 %v796_v23  ;;  %v839_v57 = vld [vmem:[#allocation7 + $0x18] sm:$0xff]   ;;  %v840_v58 = vld [vmem:[#allocation7 + $0x60] sm:$0xff]   ;;  %v842_v60 = vld [vmem:[#allocation7 + $0x68] sm:$0xff]   ;;  %v90_v0 = vsub.s32 0, %v89_v63  ;;  %v94_v2 = vsub.s32 1, %v89_v63 }
  0x4b   :  { %v841_v59 = vld [vmem:[#allocation7 + $0x20] sm:$0xff]   ;;  %v843_v61 = vld [vmem:[#allocation7 + $0x28] sm:$0xff]   ;;  %v844_v15 = vld [vmem:[#allocation7 + $0x70] sm:$0xff]  }
  0x4c   :  { %v86_v1 = vld [vmem:[%s1060_s2] sm:$0x3]  ;;  %v845_v16 = vld [vmem:[#allocation7 + $0x30] sm:$0xff]   ;;  %v847_v18 = vld [vmem:[#allocation7 + $0x38] sm:$0xff]  }
  0x4d   :  { %189 = vmatpush1.bf16.msra.mxu0 %v777_v17  ;;  %436 = vmatpush1.bf16.msra.mxu1 %v798_v26  ;;  %v91_v3 = vrot.slane %v86_v1, %v90_v0  ;;  %v95_v4 = vrot.slane %v86_v1, %v94_v2  ;;  %v846_v17 = vld [vmem:[#allocation7 + $0x78] sm:$0xff]   ;;  %v255_v19 = vld [vmem:[%s1062_s4] sm:$0x3]  ;;  %s950_s4 = smov [#allocation8]  }
  0x4e   :  { %190 = vmatprep.subr.bf16.mxu0 %v778_v20  ;;  %437 = vmatprep.subr.bf16.mxu1 %v799_v27  ;;  %v260_v20 = vrot.slane %v255_v19, %v90_v0  ;;  %s654_s21 = sshll.u32 %s950_s4, 4  ;;  %s655_s21 = int_to_ptr.vmem [resolvable:$true] %s654_s21 }
  0x4f   :  { %s914_s22 = scalar_lea.vmem %s655_s21, 128  ;;  %p919_p11 = scmp.lt.s32.totalorder %s655_s21, %s655_s21 }
  0x50   :  { %p915_p10 = scmp.ne.s32.totalorder %s655_s21, %s914_s22  ;;  %p920_p12 = scmp.lt.s32.totalorder %s914_s22, %s914_s22 }
  0x51   :  { %191 = vmatpush1.bf16.msra.mxu0 %v780_v21  ;;  %438 = vmatpush1.bf16.msra.mxu1 %v801_v29  ;;  %v264_v21 = vrot.slane %v255_v19, %v94_v2 }
  0x52   :  { %192 = vmatprep.subr.bf16.mxu0 %v781_v24  ;;  %439 = vmatprep.subr.bf16.mxu1 %v802_v30  ;;  %p921_p13 = por %p920_p12, %p919_p11 }
  0x54   :  { %p922_p0 = pnand %p921_p13, %p915_p10 }
  0x55   :  { %193 = vmatpush1.bf16.msra.mxu0 %v783_v25  ;;  %440 = vmatpush1.bf16.msra.mxu1 %v804_v31 }
  0x56   :  { %441 = vmatprep.subr.bf16.mxu1 %v805_v32  ;;  %729 = vmatprep.subr.bf16.mxu0 %v832_v50 }
  0x58   :  { %211 = vmatmul.mubr.bf16.vlgmr.msra.gmra.mrb[0].mxu0 %v69_v28 }
  0x59   :  { %442 = vmatpush1.bf16.msra.mxu1 %v807_v33  ;;  %730 = vmatpush3.bf16.msra.mxu0 %v833_v51  ;;  %v712_v33 = vld [vmem:[%s1064_s6] ss:$0 sm:$0xff] }
  0x5a   :  { %443 = vmatprep.subr.bf16.mxu1 %v808_v34  ;;  %731 = vmatprep.subr.bf16.mxu0 %v834_v52 }
  0x5d   :  { %444 = vmatpush1.bf16.msra.mxu1 %v810_v35  ;;  %732 = vmatpush3.bf16.msra.mxu0 %v835_v53 }
  0x5e   :  { %445 = vmatprep.subr.bf16.mxu1 %v811_v36  ;;  %733 = vmatprep.subr.bf16.mxu0 %v836_v54 }
  0x61   :  { %446 = vmatpush1.bf16.msra.mxu1 %v813_v37  ;;  %734 = vmatpush3.bf16.msra.mxu0 %v837_v55 }
  0x62   :  { %447 = vmatprep.subr.bf16.mxu1 %v814_v38  ;;  %735 = vmatprep.subr.bf16.mxu0 %v838_v56 }
  0x65   :  { %448 = vmatpush1.bf16.msra.mxu1 %v816_v39  ;;  %736 = vmatpush3.bf16.msra.mxu0 %v839_v57 }
  0x66   :  { %449 = vmatprep.subr.bf16.mxu1 %v817_v40  ;;  %737 = vmatprep.subr.bf16.mxu0 %v840_v58 }
  0x69   :  { %450 = vmatpush1.bf16.msra.mxu1 %v819_v41  ;;  %738 = vmatpush3.bf16.msra.mxu0 %v841_v59 }
  0x6a   :  { %451 = vmatprep.subr.bf16.mxu1 %v820_v42  ;;  %739 = vmatprep.subr.bf16.mxu0 %v842_v60 }
  0x6d   :  { %452 = vmatpush1.bf16.msra.mxu1 %v822_v43  ;;  %740 = vmatpush3.bf16.msra.mxu0 %v843_v61 }
  0x6e   :  { %453 = vmatprep.subr.bf16.mxu1 %v823_v44  ;;  %741 = vmatprep.subr.bf16.mxu0 %v844_v15 }
  0x71   :  { %454 = vmatpush1.bf16.msra.mxu1 %v825_v45  ;;  %742 = vmatpush3.bf16.msra.mxu0 %v845_v16 }
  0x72   :  { %455 = vmatprep.subr.bf16.mxu1 %v826_v46  ;;  %743 = vmatprep.subr.bf16.mxu0 %v846_v17 }
  0x75   :  { %456 = vmatpush1.bf16.msra.mxu1 %v828_v47  ;;  %744 = vmatpush3.bf16.msra.mxu0 %v847_v18 }
  0x76   :  { %457 = vmatprep.subr.bf16.mxu1 %v829_v48 }
  0x79   :  { %458 = vmatpush1.bf16.msra.mxu1 %v831_v49 }
 0x12b   :  { %v212_v5 = vpop.f32.mrb[0].mxu0 }
 0x12c   :  { %v213_v6 = vadd.f32 %v212_v5, %v91_v3  ;;  %v214_v7 = vpop.f32.mrb[1].mxu0 }
 0x12d   :  { %v215_v8 = vadd.f32 %v214_v7, %v95_v4  ;;  %v216_v9 = vpop.f32.mrb[2].mxu0 }
 0x12e   :  { %v219_v10 = vmax.f32 %v213_v6, 0.0  ;;  %v217_v11 = vpop.f32.mrb[3].mxu0 }
 0x12f   :  { %v220_v12 = vmax.f32 %v215_v8, 0.0 }
 0x130   :  { %v221_v14 = vpack.c.bf16 %v219_v10, %v219_v10 }
 0x131   :  { %v222_v13 = vpack.c.bf16 %v220_v12, %v220_v12 }
 0x133   :  { %459 = vmatprep.mubr.bf16.mxu1 %v222_v13 }
 0x134   :  { %460 = vmatmul.mubr.bf16.vlgmr.msra.gmra.mrb[0].mxu1 %v221_v14 }
 0x207   :  { %v461_v22 = vpop.f32.mrb[0].mxu1 }
 0x208   :  { %v462_v23 = vadd.f32 %v461_v22, %v260_v20  ;;  %v463_v24 = vpop.f32.mrb[1].mxu1 }
 0x209   :  { %v464_v25 = vadd.f32 %v463_v24, %v264_v21  ;;  %v465_v26 = vpop.f32.mrb[2].mxu1 }
 0x20a   :  { %v468_v27 = vmax.f32 %v462_v23, 0.0  ;;  %v466_v28 = vpop.f32.mrb[3].mxu1 }
 0x20b   :  { %v469_v29 = vmax.f32 %v464_v25, 0.0 }
 0x20c   :  { %v470_v31 = vpack.c.bf16 %v468_v27, %v468_v27 }
 0x20d   :  { %v471_v30 = vpack.c.bf16 %v469_v29, %v469_v29 }
 0x20f   :  { %639 = vmatprep.mubr.bf16.mxu0 %v471_v30 }
 0x210   :  { %640 = vmatmul.mubr.bf16.vlgmr.msra.gmra.mrb[4].mxu0 %v470_v31 }
 0x2e3   :  { %v745_v32 = vpop.f32.mrb[4].mxu0 }
 0x2e4   :  { %v746_v34 = vpop.f32.mrb[5].mxu0 }
 0x2e5   :  { %v747_v35 = vadd.f32 %v746_v34, %v745_v32  ;;  %v748_v36 = vpop.f32.mrb[6].mxu0 }
 0x2e6   :  { %v749_v37 = vpop.f32.mrb[7].mxu0 }
 0x2e7   :  { %v642_v38 = vadd.f32 %v747_v35, %v712_v33 }
 0x2e9   :  { %647 = vst [vmem:[#allocation8] sm:$0xff] %v642_v38 }
 0x2ea   :  { %925 = shalt.err (!%p922_p0)
}
 0x2eb   :  { %s926_s6 = scalar_lea.hbm %s1065_s7, 128 }
 0x2ec   :  { %p927_p1 = scmp.ne.s32.totalorder %s1065_s7, %s926_s6  ;;  %p930_p2 = scmp.lt.u32.totalorder %s926_s6, %s1065_s7 }
 0x2ee   :  { %p932_p3 = pnand %p930_p2, %p927_p1 }
 0x2f0   :  { %935 = shalt.err (!%p932_p3)
}
 0x2f1   :  { %657 = dma.vmem_to_hbm [thread:$0]  %s655_s21, 128, %s1065_s7, [#allocation4]  }
 0x2f2   :  { %940 = dma.done.wait [#allocation4], 128  }
 0x2f3   :  { %941 = vsyncadd [#allocation4], 4294967168 }
 0x2f4   :  { %661 = vsyncpa [#allocation3], 1 }
 0x2f5   :  { %662 = vsyncpa [#allocation6], 1 }
 0x2f6   :  { %663 = vsyncpa [#allocation4], 1 }

</bundles_post_ra>
